<compile_context>
chip_gen: v7x
topology: tpu7x:2x2x1
jax: 0.10.0
libtpu: 0.0.40
codegen_flags: <defaults>
</compile_context>

<pallas_src>
import jax
import jax.numpy as jnp
import numpy as np
from jax import lax
from jax.experimental import pallas as pl
from jax.experimental.pallas import tpu as pltpu

BN_EPS = 1e-5
GINE_EPS = 0.0  # pyg_nn.GINEConv default eps (train_eps=False)
LANE = 128


def _round_up(x, m):
    return (x + m - 1) // m * m


def gine_layer_kernel(
    ft_ref, cnt_ref, src_ref,                      # scalar prefetch (SMEM)
    x_ref, ea_ref, tgt_ref,
    w1_ref, b1_ref, w2_ref, b2_ref,
    wf1_ref, bf1_ref, wf2_ref, bf2_ref,
    sc1_ref, sh1_ref, sc2_ref, sh2_ref,
    out_ref,
    acc_ref, msg_ref,
):
    i = pl.program_id(0)                           # node tile   ("parallel")
    j = pl.program_id(1)                           # edge tile   ("arbitrary" reduction)
    tile_n = acc_ref.shape[0]
    tile_e = msg_ref.shape[0]

    @pl.when(j == 0)
    def _():
        acc_ref[...] = jnp.zeros_like(acc_ref)

    # ---- aggregation over one visited edge tile (skipped when this node tile has no
    #      more edge tiles) -------------------------------------------------------------
    @pl.when(j < cnt_ref[i])
    def _():
        base = (ft_ref[i] + j) * tile_e            # absolute index of first edge in tile

        # Row gather from the VMEM-resident x, driven by sorted src ids in SMEM.
        # O(TE * Cp) work; padded edges use src=0 (valid row) and are masked out below.
        def gather_body(e, carry):
            s = src_ref[base + e]
            row = jnp.maximum(x_ref[pl.ds(s, 1), :] + ea_ref[pl.ds(e, 1), :], 0.0)
            msg_ref[pl.ds(e, 1), :] = row          # relu(x_j + e_ji)
            return carry

        lax.fori_loop(0, tile_e, gather_body, 0)

        # Scatter-add into this node tile via a [TN, TE] one-hot MXU matmul.  Edges whose
        # (sorted) targets fall outside this tile (boundary / padded edges) match no row.
        local_tgt = tgt_ref[...] - i * tile_n                              # [1, TE]
        row_iota = lax.broadcasted_iota(jnp.int32, (tile_n, tile_e), 0)    # [TN, TE]
        tgt_oh = (row_iota == local_tgt).astype(jnp.float32)
        acc_ref[...] += jnp.dot(tgt_oh, msg_ref[...],
                                preferred_element_type=jnp.float32)

    # ---- dense epilogue (gin_nn, relu, residual, BN, FFN, BN) on the last edge step ---
    @pl.when(j == pl.num_programs(1) - 1)
    def _():
        start = pl.multiple_of(i * tile_n, 8)
        x_tile = x_ref[pl.ds(start, tile_n), :]                            # residual input
        h = (1.0 + GINE_EPS) * x_tile + acc_ref[...]

        # gin_nn: Linear -> ReLU -> Linear
        h = jnp.maximum(
            jnp.dot(h, w1_ref[...], preferred_element_type=jnp.float32) + b1_ref[...], 0.0)
        h = jnp.dot(h, w2_ref[...], preferred_element_type=jnp.float32) + b2_ref[...]

        h = jnp.maximum(h, 0.0)                    # F.relu
        # F.dropout(training=False) -> identity
        h = x_tile + h                             # residual
        h = h * sc1_ref[...] + sh1_ref[...]        # folded BatchNorm1d (eval)

        # feed-forward block (ff_dropout1/2 are eval-mode identities)
        ff = jnp.maximum(
            jnp.dot(h, wf1_ref[...], preferred_element_type=jnp.float32) + bf1_ref[...], 0.0)
        ff = jnp.dot(ff, wf2_ref[...], preferred_element_type=jnp.float32) + bf2_ref[...]
        h = h + ff
        h = h * sc2_ref[...] + sh2_ref[...]        # folded BatchNorm1d (eval)

        out_ref[...] = h.astype(out_ref.dtype)


def gine_conv_layer(x, edge_index, edge_attr, params, *, tile_n=256, tile_e=1024):
    """x: [N, C] f32, edge_index: [2, E] int32, edge_attr: [E, C] f32 -> [N, C] f32.

    Not jitted end-to-end: the edge schedule (sort by target, per-node-tile edge-tile
    ranges, the grid extent) is data-dependent and built on the host; the pallas_call
    itself is compiled as usual.
    """
    N, C = x.shape
    E = int(edge_index.shape[1])
    f32 = jnp.float32

    Cp = _round_up(C, LANE)                     # lane-dense channel dim
    Hp = 2 * Cp                                 # lane-dense FFN hidden dim

    TN = min(tile_n, _round_up(N, 8))           # node tile (output rows)
    Np = _round_up(N, TN)
    TE = min(tile_e, _round_up(max(E, 1), LANE))  # edge tile (reduction axis)
    Ep = _round_up(max(E, 1), TE)
    n_nt = Np // TN
    n_et = Ep // TE

    # ---- host-side edge schedule: sort by target, per-node-tile edge-tile ranges ------
    src_np = np.asarray(edge_index[0], dtype=np.int64)
    tgt_np = np.asarray(edge_index[1], dtype=np.int64)
    order_np = np.argsort(tgt_np, kind="stable")
    src_sorted = src_np[order_np]
    tgt_sorted = tgt_np[order_np]

    starts = np.searchsorted(tgt_sorted, np.arange(n_nt) * TN, side="left")
    ends = np.searchsorted(tgt_sorted, (np.arange(n_nt) + 1) * TN, side="left")
    ft = np.zeros(n_nt, np.int32)               # first edge tile per node tile
    cnt = np.zeros(n_nt, np.int32)              # number of edge tiles per node tile
    nonempty = ends > starts
    ft[nonempty] = (starts[nonempty] // TE).astype(np.int32)
    cnt[nonempty] = ((ends[nonempty] - 1) // TE - starts[nonempty] // TE + 1).astype(np.int32)
    max_cnt = max(int(cnt.max()) if cnt.size else 0, 1)

    # Padded edges: src=0 (valid gather row), tgt=Np (sentinel that matches no node row).
    src_pad = np.zeros(Ep, np.int32)
    src_pad[:E] = src_sorted
    tgt_pad = np.full((1, Ep), Np, np.int32)
    tgt_pad[0, :E] = tgt_sorted

    # ---- device-side padded operands ---------------------------------------------------
    x_p = jnp.zeros((Np, Cp), f32).at[:N, :C].set(x.astype(f32))
    ea_sorted = jnp.asarray(edge_attr, f32)[jnp.asarray(order_np)]
    ea_p = jnp.zeros((Ep, Cp), f32).at[:E, :C].set(ea_sorted)

    def pad2(w, r, c):
        return jnp.zeros((r, c), f32).at[: w.shape[0], : w.shape[1]].set(w)

    w1 = pad2(params["w1"], Cp, Cp); b1 = pad2(params["b1"], 1, Cp)
    w2 = pad2(params["w2"], Cp, Cp); b2 = pad2(params["b2"], 1, Cp)
    wf1 = pad2(params["wf1"], Cp, Hp); bf1 = pad2(params["bf1"], 1, Hp)
    wf2 = pad2(params["wf2"], Hp, Cp); bf2 = pad2(params["bf2"], 1, Cp)

    # Fold eval-mode BatchNorm into scale/shift (padded channels: scale=1, shift=0).
    def fold_bn(g, be, m, v):
        scale = g / jnp.sqrt(v + BN_EPS)
        shift = be - m * scale
        sc = jnp.ones((1, Cp), f32).at[:, :C].set(scale)
        sh = jnp.zeros((1, Cp), f32).at[:, :C].set(shift)
        return sc, sh

    sc1, sh1 = fold_bn(params["g1"], params["be1"], params["m1"], params["v1"])
    sc2, sh2 = fold_bn(params["g2"], params["be2"], params["m2"], params["v2"])

    grid = (n_nt, max_cnt)

    # Data-dependent edge-tile index: ft[i] + j, clamped so skipped steps (j >= cnt[i])
    # re-use the previous block index and issue no new DMA.
    def edge_tile(i, j, ft_r, cnt_r, src_r):
        return ft_r[i] + jnp.maximum(jnp.minimum(j, cnt_r[i] - 1), 0)

    def const2(i, j, ft_r, cnt_r, src_r):
        return (0, 0)

    in_specs = [
        pl.BlockSpec((Np, Cp), const2),                                   # x, VMEM-resident
        pl.BlockSpec((TE, Cp),
                     lambda i, j, ft_r, cnt_r, src_r: (edge_tile(i, j, ft_r, cnt_r, src_r), 0)),
        pl.BlockSpec((1, TE),
                     lambda i, j, ft_r, cnt_r, src_r: (0, edge_tile(i, j, ft_r, cnt_r, src_r))),
        pl.BlockSpec((Cp, Cp), const2), pl.BlockSpec((1, Cp), const2),    # w1, b1
        pl.BlockSpec((Cp, Cp), const2), pl.BlockSpec((1, Cp), const2),    # w2, b2
        pl.BlockSpec((Cp, Hp), const2), pl.BlockSpec((1, Hp), const2),    # wf1, bf1
        pl.BlockSpec((Hp, Cp), const2), pl.BlockSpec((1, Cp), const2),    # wf2, bf2
        pl.BlockSpec((1, Cp), const2), pl.BlockSpec((1, Cp), const2),     # BN1 scale/shift
        pl.BlockSpec((1, Cp), const2), pl.BlockSpec((1, Cp), const2),     # BN2 scale/shift
    ]
    out_spec = pl.BlockSpec((TN, Cp), lambda i, j, ft_r, cnt_r, src_r: (i, 0))

    # VMEM budget: double-buffered inputs/outputs + scratch, capped at v7x's 64 MiB/TC.
    # TODO(synk): graphs whose padded x exceeds the VMEM budget need an HBM-resident x
    # with a DMA row-gather instead of the VMEM-resident table.
    per_buf_words = (Np * Cp + TE * Cp + TE
                     + 2 * Cp * Cp + 2 * Cp * Hp + 8 * Cp + Hp
                     + TN * Cp)
    needed = (2 * per_buf_words + (TN * Cp + TE * Cp)) * 4
    vmem_limit = int(min(64 * 1024 * 1024, max(32 * 1024 * 1024, 2 * needed)))

    out = pl.pallas_call(
        gine_layer_kernel,
        out_shape=jax.ShapeDtypeStruct((Np, Cp), f32),
        grid_spec=pltpu.PrefetchScalarGridSpec(
            num_scalar_prefetch=3,
            grid=grid,
            in_specs=in_specs,
            out_specs=out_spec,
            scratch_shapes=[pltpu.VMEM((TN, Cp), jnp.float32),    # accumulator
                            pltpu.VMEM((TE, Cp), jnp.float32)],   # per-edge messages
        ),
        compiler_params=pltpu.CompilerParams(
            dimension_semantics=("parallel", "arbitrary"),
            vmem_limit_bytes=vmem_limit,
        ),
    )(jnp.asarray(ft), jnp.asarray(cnt), jnp.asarray(src_pad),
      x_p, ea_p, jnp.asarray(tgt_pad),
      w1, b1, w2, b2, wf1, bf1, wf2, bf2, sc1, sh1, sc2, sh2)

    return out[:N, :C]


def make_params(key, dim_out):
    """Deterministic synthetic parameters matching the module's __init__ shapes."""
    ks = jax.random.split(key, 8)
    d, h = dim_out, 2 * dim_out

    def lin(k, fan_in, fan_out):
        bound = 1.0 / np.sqrt(fan_in)
        kw, kb = jax.random.split(k)
        w = jax.random.uniform(kw, (fan_in, fan_out), jnp.float32, -bound, bound)
        b = jax.random.uniform(kb, (1, fan_out), jnp.float32, -bound, bound)
        return w, b

    w1, b1 = lin(ks[0], d, d)      # gin_nn Linear(dim_in, dim_out)
    w2, b2 = lin(ks[1], d, d)      # gin_nn Linear(dim_out, dim_out)
    wf1, bf1 = lin(ks[2], d, h)    # ff_linear1
    wf2, bf2 = lin(ks[3], h, d)    # ff_linear2

    g1 = 1.0 + 0.1 * jax.random.normal(ks[4], (1, d), jnp.float32)
    be1 = 0.1 * jax.random.normal(ks[5], (1, d), jnp.float32)
    m1 = jnp.zeros((1, d), jnp.float32)
    v1 = jnp.ones((1, d), jnp.float32)
    g2 = 1.0 + 0.1 * jax.random.normal(ks[6], (1, d), jnp.float32)
    be2 = 0.1 * jax.random.normal(ks[7], (1, d), jnp.float32)
    m2 = jnp.zeros((1, d), jnp.float32)
    v2 = jnp.ones((1, d), jnp.float32)

    return dict(w1=w1, b1=b1, w2=w2, b2=b2, wf1=wf1, bf1=bf1, wf2=wf2, bf2=bf2,
                g1=g1, be1=be1, m1=m1, v1=v1, g2=g2, be2=be2, m2=m2, v2=v2)


def reference_jax(x, edge_index, edge_attr, params):
    """Pure-JAX reference mirroring the PyTorch forward (eval mode)."""
    src, tgt = edge_index[0], edge_index[1]
    msg = jnp.maximum(x[src] + edge_attr, 0.0)
    agg = jnp.zeros_like(x).at[tgt].add(msg)
    h = (1.0 + GINE_EPS) * x + agg
    h = jnp.maximum(h @ params["w1"] + params["b1"], 0.0)
    h = h @ params["w2"] + params["b2"]
    h = jnp.maximum(h, 0.0)
    h = x + h
    h = (h - params["m1"]) / jnp.sqrt(params["v1"] + BN_EPS) * params["g1"] + params["be1"]
    ff = jnp.maximum(h @ params["wf1"] + params["bf1"], 0.0) @ params["wf2"] + params["bf2"]
    h = h + ff
    h = (h - params["m2"]) / jnp.sqrt(params["v2"] + BN_EPS) * params["g2"] + params["be2"]
    return h


if __name__ == "__main__":
    key = jax.random.PRNGKey(0)
    k_x, k_e, k_ei, k_p = jax.random.split(key, 4)

    N, E, D = 16, 48, 32          # nodes, edges, dim_in == dim_out (residual requires equality)

    x = jax.random.normal(k_x, (N, D), jnp.float32)
    edge_attr = jax.random.normal(k_e, (E, D), jnp.float32)
    edge_index = jax.random.randint(k_ei, (2, E), 0, N, dtype=jnp.int32)

    params = make_params(k_p, D)

    out = gine_conv_layer(x, edge_index, edge_attr, params)
    out = jax.block_until_ready(out)

    ref = reference_jax(x, edge_index, edge_attr, params)
    np.testing.assert_allclose(np.asarray(out), np.asarray(ref), rtol=1e-4, atol=1e-4)

    # TODO(synk): training-mode stochastic dropout would need pltpu.prng_* inside the kernel;
    # eval-mode (identity dropout, running-stat BatchNorm) semantics are implemented here.
    print("KERNEL_OK")
</pallas_src>

<mosaic_0001>
module attributes {stable_mosaic.version = 11 : i64} {
  func.func @gine_layer_kernel(%arg0: i32, %arg1: i32, %arg2: memref<1xi32, #tpu.memory_space<smem>>, %arg3: memref<1xi32, #tpu.memory_space<smem>>, %arg4: memref<128xi32, #tpu.memory_space<smem>>, %arg5: memref<16x128xf32, #tpu.memory_space<vmem>>, %arg6: memref<128x128xf32, #tpu.memory_space<vmem>>, %arg7: memref<1x128xi32, #tpu.memory_space<vmem>>, %arg8: memref<128x128xf32, #tpu.memory_space<vmem>>, %arg9: memref<1x128xf32, #tpu.memory_space<vmem>>, %arg10: memref<128x128xf32, #tpu.memory_space<vmem>>, %arg11: memref<1x128xf32, #tpu.memory_space<vmem>>, %arg12: memref<128x256xf32, #tpu.memory_space<vmem>>, %arg13: memref<1x256xf32, #tpu.memory_space<vmem>>, %arg14: memref<256x128xf32, #tpu.memory_space<vmem>>, %arg15: memref<1x128xf32, #tpu.memory_space<vmem>>, %arg16: memref<1x128xf32, #tpu.memory_space<vmem>>, %arg17: memref<1x128xf32, #tpu.memory_space<vmem>>, %arg18: memref<1x128xf32, #tpu.memory_space<vmem>>, %arg19: memref<1x128xf32, #tpu.memory_space<vmem>>, %arg20: memref<16x128xf32, #tpu.memory_space<vmem>>, %arg21: memref<16x128xf32, #tpu.memory_space<vmem>>, %arg22: memref<128x128xf32, #tpu.memory_space<vmem>>) attributes {dimension_semantics = [#tpu.dimension_semantics<parallel>, #tpu.dimension_semantics<arbitrary>], iteration_bounds = array<i64: 1, 1>, scalar_prefetch = 3 : i64, scratch_operands = 2 : i64, tpu.core_type = #tpu.core_type<tc>, window_params = [{pipeline_mode = #tpu.pipeline_mode<synchronous>, transform_indices = @transform_0, window_bounds = array<i64: 16, 128>}, {transform_indices = @transform_1, window_bounds = array<i64: 128, 128>}, {transform_indices = @transform_2, window_bounds = array<i64: 1, 128>}, {pipeline_mode = #tpu.pipeline_mode<synchronous>, transform_indices = @transform_3, window_bounds = array<i64: 128, 128>}, {pipeline_mode = #tpu.pipeline_mode<synchronous>, transform_indices = @transform_4, window_bounds = array<i64: 1, 128>}, {pipeline_mode = #tpu.pipeline_mode<synchronous>, transform_indices = @transform_5, window_bounds = array<i64: 128, 128>}, {pipeline_mode = #tpu.pipeline_mode<synchronous>, transform_indices = @transform_6, window_bounds = array<i64: 1, 128>}, {pipeline_mode = #tpu.pipeline_mode<synchronous>, transform_indices = @transform_7, window_bounds = array<i64: 128, 256>}, {pipeline_mode = #tpu.pipeline_mode<synchronous>, transform_indices = @transform_8, window_bounds = array<i64: 1, 256>}, {pipeline_mode = #tpu.pipeline_mode<synchronous>, transform_indices = @transform_9, window_bounds = array<i64: 256, 128>}, {pipeline_mode = #tpu.pipeline_mode<synchronous>, transform_indices = @transform_10, window_bounds = array<i64: 1, 128>}, {pipeline_mode = #tpu.pipeline_mode<synchronous>, transform_indices = @transform_11, window_bounds = array<i64: 1, 128>}, {pipeline_mode = #tpu.pipeline_mode<synchronous>, transform_indices = @transform_12, window_bounds = array<i64: 1, 128>}, {pipeline_mode = #tpu.pipeline_mode<synchronous>, transform_indices = @transform_13, window_bounds = array<i64: 1, 128>}, {pipeline_mode = #tpu.pipeline_mode<synchronous>, transform_indices = @transform_14, window_bounds = array<i64: 1, 128>}, {transform_indices = @transform_15, window_bounds = array<i64: 16, 128>}]} {
    %c0_i32 = arith.constant 0 : i32
    %0 = arith.cmpi eq, %arg1, %c0_i32 : i32
    %1 = arith.extui %0 : i1 to i32
    %c0_i32_0 = arith.constant 0 : i32
    %2 = arith.cmpi ne, %1, %c0_i32_0 : i32
    scf.if %2 {
      %cst = arith.constant 0.000000e+00 : f32
      %11 = vector.broadcast %cst : f32 to vector<16x128xf32>
      %c0 = arith.constant 0 : index
      %c0_4 = arith.constant 0 : index
      %12 = vector.load %arg21[%c0, %c0_4] : memref<16x128xf32, #tpu.memory_space<vmem>>, vector<16x128xf32>
      tpu.vector_store %arg21[%c0, %c0_4], %11 {strides = array<i32>} : memref<16x128xf32, #tpu.memory_space<vmem>>, vector<16x128xf32>,
    } else {
    }
    %3 = arith.index_cast %arg0 : i32 to index
    %4 = memref.load %arg3[%3] : memref<1xi32, #tpu.memory_space<smem>>
    %5 = arith.cmpi slt, %arg1, %4 : i32
    %6 = arith.extui %5 : i1 to i32
    %c0_i32_1 = arith.constant 0 : i32
    %7 = arith.cmpi ne, %6, %c0_i32_1 : i32
    scf.if %7 {
      %11 = arith.index_cast %arg0 : i32 to index
      %12 = memref.load %arg2[%11] : memref<1xi32, #tpu.memory_space<smem>>
      %13 = arith.addi %12, %arg1 : i32
      %c128_i32 = arith.constant 128 : i32
      %14 = arith.muli %13, %c128_i32 : i32
      %c0_i32_4 = arith.constant 0 : i32
      %c128_i32_5 = arith.constant 128 : i32
      %15 = arith.addi %c0_i32_4, %c128_i32_5 : i32
      %c1_i32 = arith.constant 1 : i32
      scf.for %arg23 = %c0_i32_4 to %15 step %c1_i32  : i32 {
        %30 = arith.addi %14, %arg23 : i32
        %31 = arith.index_cast %30 : i32 to index
        %32 = memref.load %arg4[%31] : memref<128xi32, #tpu.memory_space<smem>>
        %33 = arith.index_cast %32 : i32 to index
        %c0_14 = arith.constant 0 : index
        %34 = vector.load %arg5[%33, %c0_14] : memref<16x128xf32, #tpu.memory_space<vmem>>, vector<1x128xf32>
        %35 = arith.index_cast %arg23 : i32 to index
        %c0_15 = arith.constant 0 : index
        %36 = vector.load %arg6[%35, %c0_15] : memref<128x128xf32, #tpu.memory_space<vmem>>, vector<1x128xf32>
        %37 = arith.addf %34, %36 : vector<1x128xf32>
        %cst_16 = arith.constant 0.000000e+00 : f32
        %38 = vector.broadcast %cst_16 : f32 to vector<1x128xf32>
        %39 = arith.maximumf %37, %38 : vector<1x128xf32>
        %40 = arith.index_cast %arg23 : i32 to index
        %c0_17 = arith.constant 0 : index
        %41 = vector.load %arg22[%40, %c0_17] : memref<128x128xf32, #tpu.memory_space<vmem>>, vector<1x128xf32>
        tpu.vector_store %arg22[%40, %c0_17], %39 {strides = array<i32>} : memref<128x128xf32, #tpu.memory_space<vmem>>, vector<1x128xf32>,
      }
      %c128_i32_6 = arith.constant 128 : i32
      %c0 = arith.constant 0 : index
      %c0_7 = arith.constant 0 : index
      %16 = vector.load %arg7[%c0, %c0_7] : memref<1x128xi32, #tpu.memory_space<vmem>>, vector<1x128xi32>
      %c16_i32 = arith.constant 16 : i32
      %17 = arith.muli %arg0, %c16_i32 : i32
      %18 = vector.broadcast %17 : i32 to vector<1x128xi32>
      %19 = arith.subi %16, %18 : vector<1x128xi32>
      %20 = tpu.iota {dimensions = array<i32: 0>} : vector<16x128xi32>
      %21 = vector.broadcast %19 : vector<1x128xi32> to vector<16x128xi32>
      %22 = arith.cmpi eq, %20, %21 : vector<16x128xi32>
      %23 = arith.extui %22 : vector<16x128xi1> to vector<16x128xi32>
      %24 = arith.sitofp %23 : vector<16x128xi32> to vector<16x128xf32>
      %c0_8 = arith.constant 0 : index
      %c0_9 = arith.constant 0 : index
      %25 = vector.load %arg21[%c0_8, %c0_9] : memref<16x128xf32, #tpu.memory_space<vmem>>, vector<16x128xf32>
      %c0_10 = arith.constant 0 : index
      %c0_11 = arith.constant 0 : index
      %26 = vector.load %arg22[%c0_10, %c0_11] : memref<128x128xf32, #tpu.memory_space<vmem>>, vector<128x128xf32>
      %cst = arith.constant dense<0.000000e+00> : vector<16x128xf32>
      %27 = tpu.matmul %24, %26, %cst {dimension_numbers = #tpu.dot_dimension_numbers<[1], [0], [0], [1], [0, 0, 1, 1], [], []>} : vector<16x128xf32>, vector<128x128xf32>, vector<16x128xf32> -> vector<16x128xf32>
      %28 = arith.addf %25, %27 : vector<16x128xf32>
      %c0_12 = arith.constant 0 : index
      %c0_13 = arith.constant 0 : index
      %29 = vector.load %arg21[%c0_12, %c0_13] : memref<16x128xf32, #tpu.memory_space<vmem>>, vector<16x128xf32>
      tpu.vector_store %arg21[%c0_12, %c0_13], %28 {strides = array<i32>} : memref<16x128xf32, #tpu.memory_space<vmem>>, vector<16x128xf32>,
    } else {
    }
    %c0_i32_2 = arith.constant 0 : i32
    %8 = arith.cmpi eq, %arg1, %c0_i32_2 : i32
    %9 = arith.extui %8 : i1 to i32
    %c0_i32_3 = arith.constant 0 : i32
    %10 = arith.cmpi ne, %9, %c0_i32_3 : i32
    scf.if %10 {
      %c16_i32 = arith.constant 16 : i32
      %11 = arith.muli %arg0, %c16_i32 : i32
      %12 = tpu.assume_multiple %11, 8 : i32
      %13 = arith.index_cast %12 : i32 to index
      %c0 = arith.constant 0 : index
      %14 = vector.load %arg5[%13, %c0] : memref<16x128xf32, #tpu.memory_space<vmem>>, vector<16x128xf32>
      %cst = arith.constant 1.000000e+00 : f32
      %15 = vector.broadcast %cst : f32 to vector<16x128xf32>
      %16 = arith.mulf %15, %14 : vector<16x128xf32>
      %c0_4 = arith.constant 0 : index
      %c0_5 = arith.constant 0 : index
      %17 = vector.load %arg21[%c0_4, %c0_5] : memref<16x128xf32, #tpu.memory_space<vmem>>, vector<16x128xf32>
      %18 = arith.addf %16, %17 : vector<16x128xf32>
      %c0_6 = arith.constant 0 : index
      %c0_7 = arith.constant 0 : index
      %19 = vector.load %arg8[%c0_6, %c0_7] : memref<128x128xf32, #tpu.memory_space<vmem>>, vector<128x128xf32>
      %cst_8 = arith.constant dense<0.000000e+00> : vector<16x128xf32>
      %20 = tpu.matmul %18, %19, %cst_8 {dimension_numbers = #tpu.dot_dimension_numbers<[1], [0], [0], [1], [0, 0, 1, 1], [], []>} : vector<16x128xf32>, vector<128x128xf32>, vector<16x128xf32> -> vector<16x128xf32>
      %c0_9 = arith.constant 0 : index
      %c0_10 = arith.constant 0 : index
      %21 = vector.load %arg9[%c0_9, %c0_10] : memref<1x128xf32, #tpu.memory_space<vmem>>, vector<1x128xf32>
      %22 = vector.broadcast %21 : vector<1x128xf32> to vector<16x128xf32>
      %23 = arith.addf %20, %22 : vector<16x128xf32>
      %cst_11 = arith.constant 0.000000e+00 : f32
      %24 = vector.broadcast %cst_11 : f32 to vector<16x128xf32>
      %25 = arith.maximumf %23, %24 : vector<16x128xf32>
      %c0_12 = arith.constant 0 : index
      %c0_13 = arith.constant 0 : index
      %26 = vector.load %arg10[%c0_12, %c0_13] : memref<128x128xf32, #tpu.memory_space<vmem>>, vector<128x128xf32>
      %cst_14 = arith.constant dense<0.000000e+00> : vector<16x128xf32>
      %27 = tpu.matmul %25, %26, %cst_14 {dimension_numbers = #tpu.dot_dimension_numbers<[1], [0], [0], [1], [0, 0, 1, 1], [], []>} : vector<16x128xf32>, vector<128x128xf32>, vector<16x128xf32> -> vector<16x128xf32>
      %c0_15 = arith.constant 0 : index
      %c0_16 = arith.constant 0 : index
      %28 = vector.load %arg11[%c0_15, %c0_16] : memref<1x128xf32, #tpu.memory_space<vmem>>, vector<1x128xf32>
      %29 = vector.broadcast %28 : vector<1x128xf32> to vector<16x128xf32>
      %30 = arith.addf %27, %29 : vector<16x128xf32>
      %cst_17 = arith.constant 0.000000e+00 : f32
      %31 = vector.broadcast %cst_17 : f32 to vector<16x128xf32>
      %32 = arith.maximumf %30, %31 : vector<16x128xf32>
      %33 = arith.addf %14, %32 : vector<16x128xf32>
      %c0_18 = arith.constant 0 : index
      %c0_19 = arith.constant 0 : index
      %34 = vector.load %arg16[%c0_18, %c0_19] : memref<1x128xf32, #tpu.memory_space<vmem>>, vector<1x128xf32>
      %35 = vector.broadcast %34 : vector<1x128xf32> to vector<16x128xf32>
      %36 = arith.mulf %33, %35 : vector<16x128xf32>
      %c0_20 = arith.constant 0 : index
      %c0_21 = arith.constant 0 : index
      %37 = vector.load %arg17[%c0_20, %c0_21] : memref<1x128xf32, #tpu.memory_space<vmem>>, vector<1x128xf32>
      %38 = vector.broadcast %37 : vector<1x128xf32> to vector<16x128xf32>
      %39 = arith.addf %36, %38 : vector<16x128xf32>
      %c0_22 = arith.constant 0 : index
      %c0_23 = arith.constant 0 : index
      %40 = vector.load %arg12[%c0_22, %c0_23] : memref<128x256xf32, #tpu.memory_space<vmem>>, vector<128x256xf32>
      %cst_24 = arith.constant dense<0.000000e+00> : vector<16x256xf32>
      %41 = tpu.matmul %39, %40, %cst_24 {dimension_numbers = #tpu.dot_dimension_numbers<[1], [0], [0], [1], [0, 0, 1, 1], [], []>} : vector<16x128xf32>, vector<128x256xf32>, vector<16x256xf32> -> vector<16x256xf32>
      %c0_25 = arith.constant 0 : index
      %c0_26 = arith.constant 0 : index
      %42 = vector.load %arg13[%c0_25, %c0_26] : memref<1x256xf32, #tpu.memory_space<vmem>>, vector<1x256xf32>
      %43 = vector.broadcast %42 : vector<1x256xf32> to vector<16x256xf32>
      %44 = arith.addf %41, %43 : vector<16x256xf32>
      %cst_27 = arith.constant 0.000000e+00 : f32
      %45 = vector.broadcast %cst_27 : f32 to vector<16x256xf32>
      %46 = arith.maximumf %44, %45 : vector<16x256xf32>
      %c0_28 = arith.constant 0 : index
      %c0_29 = arith.constant 0 : index
      %47 = vector.load %arg14[%c0_28, %c0_29] : memref<256x128xf32, #tpu.memory_space<vmem>>, vector<256x128xf32>
      %cst_30 = arith.constant dense<0.000000e+00> : vector<16x128xf32>
      %48 = tpu.matmul %46, %47, %cst_30 {dimension_numbers = #tpu.dot_dimension_numbers<[1], [0], [0], [1], [0, 0, 1, 1], [], []>} : vector<16x256xf32>, vector<256x128xf32>, vector<16x128xf32> -> vector<16x128xf32>
      %c0_31 = arith.constant 0 : index
      %c0_32 = arith.constant 0 : index
      %49 = vector.load %arg15[%c0_31, %c0_32] : memref<1x128xf32, #tpu.memory_space<vmem>>, vector<1x128xf32>
      %50 = vector.broadcast %49 : vector<1x128xf32> to vector<16x128xf32>
      %51 = arith.addf %48, %50 : vector<16x128xf32>
      %52 = arith.addf %39, %51 : vector<16x128xf32>
      %c0_33 = arith.constant 0 : index
      %c0_34 = arith.constant 0 : index
      %53 = vector.load %arg18[%c0_33, %c0_34] : memref<1x128xf32, #tpu.memory_space<vmem>>, vector<1x128xf32>
      %54 = vector.broadcast %53 : vector<1x128xf32> to vector<16x128xf32>
      %55 = arith.mulf %52, %54 : vector<16x128xf32>
      %c0_35 = arith.constant 0 : index
      %c0_36 = arith.constant 0 : index
      %56 = vector.load %arg19[%c0_35, %c0_36] : memref<1x128xf32, #tpu.memory_space<vmem>>, vector<1x128xf32>
      %57 = vector.broadcast %56 : vector<1x128xf32> to vector<16x128xf32>
      %58 = arith.addf %55, %57 : vector<16x128xf32>
      %c0_37 = arith.constant 0 : index
      %c0_38 = arith.constant 0 : index
      %59 = vector.load %arg20[%c0_37, %c0_38] : memref<16x128xf32, #tpu.memory_space<vmem>>, vector<16x128xf32>
      tpu.vector_store %arg20[%c0_37, %c0_38], %58 {strides = array<i32>} : memref<16x128xf32, #tpu.memory_space<vmem>>, vector<16x128xf32>,
    } else {
    }
    return
  }
  func.func @transform_0(%arg0: i32, %arg1: i32, %arg2: memref<1xi32, #tpu.memory_space<smem>>, %arg3: memref<1xi32, #tpu.memory_space<smem>>, %arg4: memref<128xi32, #tpu.memory_space<smem>>) -> (i32, i32) {
    %c0_i32 = arith.constant 0 : i32
    %c0_i32_0 = arith.constant 0 : i32
    %c0_i32_1 = arith.constant 0 : i32
    return %c0_i32, %c0_i32_0 : i32, i32
  }
  func.func @transform_1(%arg0: i32, %arg1: i32, %arg2: memref<1xi32, #tpu.memory_space<smem>>, %arg3: memref<1xi32, #tpu.memory_space<smem>>, %arg4: memref<128xi32, #tpu.memory_space<smem>>) -> (i32, i32) {
    %0 = arith.index_cast %arg0 : i32 to index
    %1 = memref.load %arg2[%0] : memref<1xi32, #tpu.memory_space<smem>>
    %2 = arith.index_cast %arg0 : i32 to index
    %3 = memref.load %arg3[%2] : memref<1xi32, #tpu.memory_space<smem>>
    %c1_i32 = arith.constant 1 : i32
    %4 = arith.subi %3, %c1_i32 : i32
    %5 = arith.minsi %arg1, %4 : i32
    %c0_i32 = arith.constant 0 : i32
    %6 = arith.maxsi %5, %c0_i32 : i32
    %7 = arith.addi %1, %6 : i32
    %c0_i32_0 = arith.constant 0 : i32
    %c0_i32_1 = arith.constant 0 : i32
    return %7, %c0_i32_0 : i32, i32
  }
  func.func @transform_2(%arg0: i32, %arg1: i32, %arg2: memref<1xi32, #tpu.memory_space<smem>>, %arg3: memref<1xi32, #tpu.memory_space<smem>>, %arg4: memref<128xi32, #tpu.memory_space<smem>>) -> (i32, i32) {
    %0 = arith.index_cast %arg0 : i32 to index
    %1 = memref.load %arg2[%0] : memref<1xi32, #tpu.memory_space<smem>>
    %2 = arith.index_cast %arg0 : i32 to index
    %3 = memref.load %arg3[%2] : memref<1xi32, #tpu.memory_space<smem>>
    %c1_i32 = arith.constant 1 : i32
    %4 = arith.subi %3, %c1_i32 : i32
    %5 = arith.minsi %arg1, %4 : i32
    %c0_i32 = arith.constant 0 : i32
    %6 = arith.maxsi %5, %c0_i32 : i32
    %7 = arith.addi %1, %6 : i32
    %c0_i32_0 = arith.constant 0 : i32
    %c0_i32_1 = arith.constant 0 : i32
    return %c0_i32_0, %7 : i32, i32
  }
  func.func @transform_3(%arg0: i32, %arg1: i32, %arg2: memref<1xi32, #tpu.memory_space<smem>>, %arg3: memref<1xi32, #tpu.memory_space<smem>>, %arg4: memref<128xi32, #tpu.memory_space<smem>>) -> (i32, i32) {
    %c0_i32 = arith.constant 0 : i32
    %c0_i32_0 = arith.constant 0 : i32
    %c0_i32_1 = arith.constant 0 : i32
    return %c0_i32, %c0_i32_0 : i32, i32
  }
  func.func @transform_4(%arg0: i32, %arg1: i32, %arg2: memref<1xi32, #tpu.memory_space<smem>>, %arg3: memref<1xi32, #tpu.memory_space<smem>>, %arg4: memref<128xi32, #tpu.memory_space<smem>>) -> (i32, i32) {
    %c0_i32 = arith.constant 0 : i32
    %c0_i32_0 = arith.constant 0 : i32
    %c0_i32_1 = arith.constant 0 : i32
    return %c0_i32, %c0_i32_0 : i32, i32
  }
  func.func @transform_5(%arg0: i32, %arg1: i32, %arg2: memref<1xi32, #tpu.memory_space<smem>>, %arg3: memref<1xi32, #tpu.memory_space<smem>>, %arg4: memref<128xi32, #tpu.memory_space<smem>>) -> (i32, i32) {
    %c0_i32 = arith.constant 0 : i32
    %c0_i32_0 = arith.constant 0 : i32
    %c0_i32_1 = arith.constant 0 : i32
    return %c0_i32, %c0_i32_0 : i32, i32
  }
  func.func @transform_6(%arg0: i32, %arg1: i32, %arg2: memref<1xi32, #tpu.memory_space<smem>>, %arg3: memref<1xi32, #tpu.memory_space<smem>>, %arg4: memref<128xi32, #tpu.memory_space<smem>>) -> (i32, i32) {
    %c0_i32 = arith.constant 0 : i32
    %c0_i32_0 = arith.constant 0 : i32
    %c0_i32_1 = arith.constant 0 : i32
    return %c0_i32, %c0_i32_0 : i32, i32
  }
  func.func @transform_7(%arg0: i32, %arg1: i32, %arg2: memref<1xi32, #tpu.memory_space<smem>>, %arg3: memref<1xi32, #tpu.memory_space<smem>>, %arg4: memref<128xi32, #tpu.memory_space<smem>>) -> (i32, i32) {
    %c0_i32 = arith.constant 0 : i32
    %c0_i32_0 = arith.constant 0 : i32
    %c0_i32_1 = arith.constant 0 : i32
    return %c0_i32, %c0_i32_0 : i32, i32
  }
  func.func @transform_8(%arg0: i32, %arg1: i32, %arg2: memref<1xi32, #tpu.memory_space<smem>>, %arg3: memref<1xi32, #tpu.memory_space<smem>>, %arg4: memref<128xi32, #tpu.memory_space<smem>>) -> (i32, i32) {
    %c0_i32 = arith.constant 0 : i32
    %c0_i32_0 = arith.constant 0 : i32
    %c0_i32_1 = arith.constant 0 : i32
    return %c0_i32, %c0_i32_0 : i32, i32
  }
  func.func @transform_9(%arg0: i32, %arg1: i32, %arg2: memref<1xi32, #tpu.memory_space<smem>>, %arg3: memref<1xi32, #tpu.memory_space<smem>>, %arg4: memref<128xi32, #tpu.memory_space<smem>>) -> (i32, i32) {
    %c0_i32 = arith.constant 0 : i32
    %c0_i32_0 = arith.constant 0 : i32
    %c0_i32_1 = arith.constant 0 : i32
    return %c0_i32, %c0_i32_0 : i32, i32
  }
  func.func @transform_10(%arg0: i32, %arg1: i32, %arg2: memref<1xi32, #tpu.memory_space<smem>>, %arg3: memref<1xi32, #tpu.memory_space<smem>>, %arg4: memref<128xi32, #tpu.memory_space<smem>>) -> (i32, i32) {
    %c0_i32 = arith.constant 0 : i32
    %c0_i32_0 = arith.constant 0 : i32
    %c0_i32_1 = arith.constant 0 : i32
    return %c0_i32, %c0_i32_0 : i32, i32
  }
  func.func @transform_11(%arg0: i32, %arg1: i32, %arg2: memref<1xi32, #tpu.memory_space<smem>>, %arg3: memref<1xi32, #tpu.memory_space<smem>>, %arg4: memref<128xi32, #tpu.memory_space<smem>>) -> (i32, i32) {
    %c0_i32 = arith.constant 0 : i32
    %c0_i32_0 = arith.constant 0 : i32
    %c0_i32_1 = arith.constant 0 : i32
    return %c0_i32, %c0_i32_0 : i32, i32
  }
  func.func @transform_12(%arg0: i32, %arg1: i32, %arg2: memref<1xi32, #tpu.memory_space<smem>>, %arg3: memref<1xi32, #tpu.memory_space<smem>>, %arg4: memref<128xi32, #tpu.memory_space<smem>>) -> (i32, i32) {
    %c0_i32 = arith.constant 0 : i32
    %c0_i32_0 = arith.constant 0 : i32
    %c0_i32_1 = arith.constant 0 : i32
    return %c0_i32, %c0_i32_0 : i32, i32
  }
  func.func @transform_13(%arg0: i32, %arg1: i32, %arg2: memref<1xi32, #tpu.memory_space<smem>>, %arg3: memref<1xi32, #tpu.memory_space<smem>>, %arg4: memref<128xi32, #tpu.memory_space<smem>>) -> (i32, i32) {
    %c0_i32 = arith.constant 0 : i32
    %c0_i32_0 = arith.constant 0 : i32
    %c0_i32_1 = arith.constant 0 : i32
    return %c0_i32, %c0_i32_0 : i32, i32
  }
  func.func @transform_14(%arg0: i32, %arg1: i32, %arg2: memref<1xi32, #tpu.memory_space<smem>>, %arg3: memref<1xi32, #tpu.memory_space<smem>>, %arg4: memref<128xi32, #tpu.memory_space<smem>>) -> (i32, i32) {
    %c0_i32 = arith.constant 0 : i32
    %c0_i32_0 = arith.constant 0 : i32
    %c0_i32_1 = arith.constant 0 : i32
    return %c0_i32, %c0_i32_0 : i32, i32
  }
  func.func @transform_15(%arg0: i32, %arg1: i32, %arg2: memref<1xi32, #tpu.memory_space<smem>>, %arg3: memref<1xi32, #tpu.memory_space<smem>>, %arg4: memref<128xi32, #tpu.memory_space<smem>>) -> (i32, i32) {
    %c0_i32 = arith.constant 0 : i32
    %c0_i32_0 = arith.constant 0 : i32
    return %arg0, %c0_i32 : i32, i32
  }
}

</mosaic_0001>

<bundles_post_ra>
// kernel: tpu_custom_call.1
= control target key start
LH: loop header
LB: loop body
LE: loop exit
PB: predicated region body
PF: predicated region fallthrough
CT: control target
= control target key end

     0   :  { %s1763_s0 = inlined_call_operand.<no memory space> [shape: s32[1], index: 0, kind: input, shape index: {}]   ;;  %s1764_s1 = inlined_call_operand.<no memory space> [shape: s32[1], index: 1, kind: input, shape index: {}]   ;;  %s1765_s2 = inlined_call_operand.vmem [shape: s32[128], index: 2, kind: input, shape index: {}]   ;;  %s1766_s3 = inlined_call_operand.hbm [shape: f32[16,128], index: 3, kind: input, shape index: {}]   ;;  %s1767_s4 = inlined_call_operand.hbm [shape: f32[128,128], index: 4, kind: input, shape index: {}]   ;;  %s1768_s5 = inlined_call_operand.vmem [shape: s32[1,128], index: 5, kind: input, shape index: {}]   ;;  %s1769_s6 = inlined_call_operand.hbm [shape: f32[128,128], index: 6, kind: input, shape index: {}]   ;;  %s1770_s7 = inlined_call_operand.vmem [shape: f32[1,128], index: 7, kind: input, shape index: {}]   ;;  %s1771_s8 = inlined_call_operand.hbm [shape: f32[128,128], index: 8, kind: input, shape index: {}]   ;;  %s1772_s9 = inlined_call_operand.vmem [shape: f32[1,128], index: 9, kind: input, shape index: {}]   ;;  %s1773_s10 = inlined_call_operand.hbm [shape: f32[128,256], index: 10, kind: input, shape index: {}]   ;;  %s1774_s11 = inlined_call_operand.vmem [shape: f32[1,256], index: 11, kind: input, shape index: {}]   ;;  %s1775_s12 = inlined_call_operand.hbm [shape: f32[256,128], index: 12, kind: input, shape index: {}]   ;;  %s1776_s13 = inlined_call_operand.vmem [shape: f32[1,128], index: 13, kind: input, shape index: {}]   ;;  %s1777_s14 = inlined_call_operand.vmem [shape: f32[1,128], index: 14, kind: input, shape index: {}]   ;;  %s1778_s15 = inlined_call_operand.vmem [shape: f32[1,128], index: 15, kind: input, shape index: {}]   ;;  %s1779_s16 = inlined_call_operand.vmem [shape: f32[1,128], index: 16, kind: input, shape index: {}]   ;;  %s1780_s17 = inlined_call_operand.vmem [shape: f32[1,128], index: 17, kind: input, shape index: {}]   ;;  %s1781_s18 = inlined_call_operand.hbm [shape: f32[16,128], index: 18, kind: output, shape index: {}]  }
   0x1   :  { %1783 = sst [smem:[#allocation26_spill]] %s1763_s0 }
   0x2   :  { %1784 = sst [smem:[#allocation27_spill]] %s1764_s1  ;;  %s1790_s29 = sld [smem:[#allocation26_spill]] }
   0x3   :  { %1785 = sst [smem:[#allocation28_spill]] %s1765_s2 }
   0x4   :  { %1786 = sst [smem:[#allocation29_spill]] %s1776_s13  ;;  %s1791_s13 = sld [smem:[#allocation28_spill]] }
   0x5   :  { %1787 = sst [smem:[#allocation30_spill]] %s1779_s16 }
   0x6   :  { %1788 = sst [smem:[#allocation31_spill]] %s1780_s17 }
   0x7   :  { %1789 = sst [smem:[#allocation32_spill]] %s1781_s18 }
   0x8   :  { %23 = sst [smem:[#allocation5]] %s1790_s29 }
   0xa   :  { %s25_s19 = sshll.u32 %s1791_s13, 4  ;;  %s26_s19 = int_to_ptr.vmem [resolvable:$true] %s25_s19 }
   0xb   :  { %s1294_s1 = scalar_lea.vmem %s26_s19, 16  ;;  %p1299_p1 = scmp.lt.s32.totalorder %s26_s19, %s26_s19 }
   0xc   :  { %p1295_p0 = scmp.ne.s32.totalorder %s26_s19, %s1294_s1  ;;  %p1300_p2 = scmp.lt.s32.totalorder %s1294_s1, %s1294_s1 }
   0xe   :  { %p1301_p3 = por %p1300_p2, %p1299_p1 }
  0x10   :  { %p1302_p4 = pnand %p1301_p3, %p1295_p0 }
  0x12   :  { %1305 = shalt.err (!%p1302_p4)  }
  0x13   :  { %s1482_s20 = smov [#allocation7]  }
  0x14   :  { %28 = dma.vmem_to_smem %s26_s19, 16, %s1482_s20, [#allocation4] }
  0x15   :  { %1466 = dma.done.wait [#allocation4], 16 }
  0x16   :  { %1467 = vsyncadd [#allocation4], 4294967280 }
  0x17   :  { %30 = sfence }
  0x18   :  { %31 = vsyncpa [#allocation9], 0 }
  0x19   :  { %32 = vsyncpa [#allocation12], 0 }
  0x1a   :  { %33 = vsyncpa [#allocation15], 0 }
  0x1b   :  { %34 = vsyncpa [#allocation18], 0 }
  0x1c   :  { %35 = vsyncpa [#allocation10], 0  ;;  %s50_s21 = sld [smem:[#allocation5]]  ;;  %s1483_s13 = smov [#allocation11]  }
  0x1d   :  { %s64_s22 = sshll.u32 %s1483_s13, 4  ;;  %s1484_s2 = smov [#allocation14]   ;;  %s1597_s22 = int_to_ptr.vmem [resolvable:$true] %s64_s22 }
  0x1e   :  { %s111_s23 = sshll.u32 %s1484_s2, 4  ;;  %s1306_s26 = scalar_lea.hbm %s1771_s8, 2048  ;;  %s112_s23 = int_to_ptr.vmem [resolvable:$true] %s111_s23 }
  0x1f   :  { %p1307_p5 = scmp.ne.s32.totalorder %s1771_s8, %s1306_s26  ;;  %p1310_p6 = scmp.lt.u32.totalorder %s1306_s26, %s1771_s8 }
  0x21   :  { %p1312_p7 = pnand %p1310_p6, %p1307_p5 }
  0x23   :  { %1315 = shalt.err (!%p1312_p7)
}
  0x24   :  { %s1316_s0 = scalar_lea.vmem %s112_s23, 2048  ;;  %p1321_p9 = scmp.lt.s32.totalorder %s112_s23, %s112_s23 }
  0x25   :  { %p1317_p8 = scmp.ne.s32.totalorder %s112_s23, %s1316_s0  ;;  %p1322_p10 = scmp.lt.s32.totalorder %s1316_s0, %s1316_s0 }
  0x27   :  { %p1323_p11 = por %p1322_p10, %p1321_p9 }
  0x29   :  { %p1324_p12 = pnand %p1323_p11, %p1317_p8 }
  0x2b   :  { %1327 = shalt.err (!%p1324_p12)
}
  0x2c   :  { %s1485_s19 = smov 128   ;;  %s1486_s1 = smov 8  }
  0x2d   :  { %117 = dma.hbm_to_vmem [thread:$0]  %s1771_s8, 2048, %s112_s23, [#allocation15], %s1485_s19, %s1485_s19, %s1486_s1  }
  0x2e   :  { %s1487_s2 = smov [#allocation8]   ;;  %s914_s25 = sshll.u32 %s50_s21, 11 }
  0x2f   :  { %s41_s24 = sshll.u32 %s1487_s2, 4  ;;  %s63_s28 = scalar_lea.hbm %s1767_s4, %s914_s25  ;;  %s1614_s24 = int_to_ptr.vmem [resolvable:$true] %s41_s24 }
  0x30   :  { %s1488_s29 = smov [#allocation13]   ;;  %s1328_s0 = scalar_lea.hbm %s63_s28, 2048 }
  0x31   :  { %s1619_s30 = sshll.u32 %s1488_s29, 4  ;;  %p1329_p13 = scmp.ne.s32.totalorder %s63_s28, %s1328_s0  ;;  %s98_s30 = int_to_ptr.vmem [resolvable:$true] %s1619_s30 }
  0x32   :  { %s1330_s16 = scalar_lea.hbm %s1767_s4, 2048  ;;  %p1331_p0 = scmp.lt.u32.totalorder %s63_s28, %s1767_s4 }
  0x33   :  { %p1332_p1 = scmp.lt.u32.totalorder %s1330_s16, %s1328_s0  ;;  %p1334_p3 = scmp.lt.u32.totalorder %s1328_s0, %s63_s28 }
  0x35   :  { %p1333_p2 = por %p1332_p1, %p1331_p0 }
  0x37   :  { %p1335_p4 = por %p1334_p3, %p1333_p2 }
  0x39   :  { %p1336_p5 = pnand %p1335_p4, %p1329_p13 }
  0x3b   :  { %1339 = shalt.err (!%p1336_p5)
}
  0x3c   :  { %s1340_s21 = scalar_lea.vmem %s1597_s22, 2048  ;;  %p1345_p7 = scmp.lt.s32.totalorder %s1597_s22, %s1597_s22 }
  0x3d   :  { %p1341_p6 = scmp.ne.s32.totalorder %s1597_s22, %s1340_s21  ;;  %p1346_p8 = scmp.lt.s32.totalorder %s1340_s21, %s1340_s21 }
  0x3f   :  { %p1347_p9 = por %p1346_p8, %p1345_p7 }
  0x41   :  { %p1348_p10 = pnand %p1347_p9, %p1341_p6 }
  0x43   :  { %1351 = shalt.err (!%p1348_p10)
}
  0x44   :  { %70 = dma.hbm_to_vmem [thread:$0]  %s63_s28, 2048, %s1597_s22, [#allocation12], %s1485_s19, %s1485_s19, %s1486_s1  }
  0x45   :  { %s1352_s17 = scalar_lea.hbm %s1766_s3, 256 }
  0x46   :  { %p1353_p11 = scmp.ne.s32.totalorder %s1766_s3, %s1352_s17  ;;  %p1356_p12 = scmp.lt.u32.totalorder %s1352_s17, %s1766_s3 }
  0x48   :  { %p1358_p13 = pnand %p1356_p12, %p1353_p11 }
  0x4a   :  { %1361 = shalt.err (!%p1358_p13)
}
  0x4b   :  { %s1362_s25 = scalar_lea.vmem %s1614_s24, 256  ;;  %p1367_p1 = scmp.lt.s32.totalorder %s1614_s24, %s1614_s24 }
  0x4c   :  { %p1363_p0 = scmp.ne.s32.totalorder %s1614_s24, %s1362_s25  ;;  %p1368_p2 = scmp.lt.s32.totalorder %s1362_s25, %s1362_s25 }
  0x4e   :  { %p1369_p3 = por %p1368_p2, %p1367_p1 }
  0x50   :  { %p1370_p4 = pnand %p1369_p3, %p1363_p0 }
  0x52   :  { %1373 = shalt.err (!%p1370_p4)
}
  0x53   :  { %47 = dma.hbm_to_vmem [thread:$0]  %s1766_s3, 256, %s1614_s24, [#allocation9], %s1485_s19, %s1485_s19, %s1486_s1  }
  0x54   :  { %s1374_s29 = scalar_lea.hbm %s1769_s6, 2048 }
  0x55   :  { %p1375_p5 = scmp.ne.s32.totalorder %s1769_s6, %s1374_s29  ;;  %p1378_p6 = scmp.lt.u32.totalorder %s1374_s29, %s1769_s6 }
  0x57   :  { %p1380_p7 = pnand %p1378_p6, %p1375_p5 }
  0x59   :  { %1383 = shalt.err (!%p1380_p7)
}
  0x5a   :  { %s1384_s4 = scalar_lea.vmem %s98_s30, 2048  ;;  %p1389_p9 = scmp.lt.s32.totalorder %s98_s30, %s98_s30 }
  0x5b   :  { %p1385_p8 = scmp.ne.s32.totalorder %s98_s30, %s1384_s4  ;;  %p1390_p10 = scmp.lt.s32.totalorder %s1384_s4, %s1384_s4 }
  0x5d   :  { %p1391_p11 = por %p1390_p10, %p1389_p9 }
  0x5f   :  { %p1392_p12 = pnand %p1391_p11, %p1385_p8 }
  0x61   :  { %1395 = shalt.err (!%p1392_p12)
}
  0x62   :  { %103 = dma.hbm_to_vmem [thread:$0]  %s1769_s6, 2048, %s98_s30, [#allocation12], %s1485_s19, %s1485_s19, %s1486_s1  }
  0x63   :  { %s1489_s16 = smov [#allocation16]   ;;  %s1396_s13 = scalar_lea.hbm %s1773_s10, 4096 }
  0x64   :  { %s125_s17 = sshll.u32 %s1489_s16, 4  ;;  %p1397_p13 = scmp.ne.s32.totalorder %s1773_s10, %s1396_s13  ;;  %s126_s17 = int_to_ptr.vmem [resolvable:$true] %s125_s17 }
  0x65   :  { %p1400_p0 = scmp.lt.u32.totalorder %s1396_s13, %s1773_s10 }
  0x67   :  { %p1402_p1 = pnand %p1400_p0, %p1397_p13 }
  0x69   :  { %1405 = shalt.err (!%p1402_p1)
}
  0x6a   :  { %s1406_s27 = scalar_lea.vmem %s126_s17, 4096  ;;  %p1411_p3 = scmp.lt.s32.totalorder %s126_s17, %s126_s17 }
  0x6b   :  { %p1407_p2 = scmp.ne.s32.totalorder %s126_s17, %s1406_s27  ;;  %p1412_p4 = scmp.lt.s32.totalorder %s1406_s27, %s1406_s27 }
  0x6d   :  { %p1413_p5 = por %p1412_p4, %p1411_p3 }
  0x6f   :  { %p1414_p6 = pnand %p1413_p5, %p1407_p2 }
  0x71   :  { %1417 = shalt.err (!%p1414_p6)
}
  0x72   :  { %s1490_s6 = smov 256   ;;  %s1491_s30 = smov 16  }
  0x73   :  { %131 = dma.hbm_to_vmem [thread:$0]  %s1773_s10, 4096, %s126_s17, [#allocation15], %s1490_s6, %s1490_s6, %s1491_s30  }
  0x74   :  { %s1492_s0 = smov [#allocation17]   ;;  %s1418_s4 = scalar_lea.hbm %s1775_s12, 4096 }
  0x75   :  { %s139_s20 = sshll.u32 %s1492_s0, 4  ;;  %p1419_p7 = scmp.ne.s32.totalorder %s1775_s12, %s1418_s4  ;;  %s140_s20 = int_to_ptr.vmem [resolvable:$true] %s139_s20 }
  0x76   :  { %p1422_p8 = scmp.lt.u32.totalorder %s1418_s4, %s1775_s12 }
  0x78   :  { %p1424_p9 = pnand %p1422_p8, %p1419_p7 }
  0x7a   :  { %1427 = shalt.err (!%p1424_p9)
}
  0x7b   :  { %s1428_s23 = scalar_lea.vmem %s140_s20, 4096  ;;  %p1433_p11 = scmp.lt.s32.totalorder %s140_s20, %s140_s20 }
  0x7c   :  { %p1429_p10 = scmp.ne.s32.totalorder %s140_s20, %s1428_s23  ;;  %p1434_p12 = scmp.lt.s32.totalorder %s1428_s23, %s1428_s23 }
  0x7e   :  { %p1435_p13 = por %p1434_p12, %p1433_p11 }
  0x80   :  { %p1436_p0 = pnand %p1435_p13, %p1429_p10 }
  0x82   :  { %1439 = shalt.err (!%p1436_p0)
}
  0x83   :  { %145 = dma.hbm_to_vmem [thread:$0]  %s1775_s12, 4096, %s140_s20, [#allocation18], %s1485_s19, %s1485_s19, %s1486_s1  }
  0x84   :  { %1468 = dma.done.wait [#allocation9], 256  }
  0x85   :  { %1469 = vsyncadd [#allocation9], 4294967040 }
  0x86   :  { %1470 = dma.done.wait [#allocation12], 4096  }
  0x87   :  { %1471 = vsyncadd [#allocation12], 4294963200 }
  0x88   :  { %1472 = dma.done.wait [#allocation15], 6144  }
  0x89   :  { %1473 = vsyncadd [#allocation15], 4294961152 }
  0x8a   :  { %1474 = dma.done.wait [#allocation18], 4096  }
  0x8b   :  { %1475 = vsyncadd [#allocation18], 4294963200  ;;  %s194_s13 = sld [smem:[#allocation5]]  ;;  %v1493_v0 = vmov 0.0   ;;  %s1792_s27 = sld [smem:[#allocation27_spill]] }
  0x8c   :  { %217 = vst [vmem:[#allocation2] sm:$0xff] %v1493_v0  ;;  %218 = vst [vmem:[#allocation2 + $0x8] sm:$0xff] %v1493_v0 }
  0x91   :  { %p202_p1 = scmp.lt.s32.totalorder %s194_s13, 0  ;;  %p900_p2 = scmp.le.s32.totalorder %s1792_s27, 0 }
  0x92   :  { %s224_s6 = sld [smem:[#allocation5]] (!%p900_p2)  ;;  %s1478_s28 = smov (!%p900_p2), 0  }
  0x93   :  { %s1798_s13 = smov (!%p202_p1, %s194_s13), 0  ;;  %223 = sbr.rel (%p900_p2) target bundleno = 425 (0x1a9), region = 93 }
  0x94   :  { %s204_s25 = scalar_lea.vmem %s1768_s5, %s1798_s13 }
  0x98   :  { %s901_s30 = sshll.u32 (!%p900_p2), %s224_s6, 7 }
  0x9a LB: > { %s233_s29 = sadd.s32 %s1480_s28, %s901_s30  ;;  %s237_s20 = scalar_lea.vmem [#allocation11], %s1480_s28  ;;  %s1480_s28 = sphi %s1478_s28, %s232_s28  }
  0x9b   : > { %s234_s0 = sld [smem:[#allocation7 + %s233_s29]]  ;;  %v238_v1 = vld [vmem:[%s237_s20] sm:$0x1]  ;;  %s241_s21 = scalar_lea.vmem [#allocation3], %s1480_s28 }
  0x9c   : > { %s232_s28 = sadd.s32 1, %s1480_s28  }
  0x9d   : > { %p229_p3 = scmp.ge.s32.totalorder %s232_s28, 128  }
  0x9e   :  { %v247_v8 = vlaneseq (%p229_p3)  ;;  %v902_v16 = vld [vmem:[%s204_s25] ss:$0 sm:$0xff] (%p229_p3)  ;;  %v1494_v19 = vmov (%p229_p3), 1.0   ;;  %v261_v34 = vld [vmem:[#allocation2 + $0x8] sm:$0xff] (%p229_p3) }
  0x9f   :  { %v260_v35 = vld [vmem:[#allocation2] sm:$0xff] (%p229_p3) }
  0xa0   :  { %v248_v14 = vshrl.u32 (%p229_p3), %v247_v8, 7 }
  0xa1   : > { %s235_s8 = scalar_lea.vmem [#allocation8], %s234_s0  ;;  %231 = sbr.rel (!%p229_p3) target bundleno = 154 (0x9a), region = 131 }
  0xa2   : > { %v236_v2 = vld [vmem:[%s235_s8] sm:$0x1]  ;;  %vm254_vm0 = vcmp.eq.s32.totalorder (%p229_p3), %v248_v14, %v902_v16  ;;  %v249_v33 = vadd.s32 (%p229_p3), 8, %v248_v14 }
  0xa3   : > { %v239_v3 = vadd.f32 %v238_v1, %v236_v2  ;;  %1039 = vmatprep.mubr.msk.f32.mxu0 (%p229_p3), %vm254_vm0, %v1494_v19 }
  0xa4   :  { %vm255_vm1 = vcmp.eq.s32.totalorder (%p229_p3), %v249_v33, %v902_v16 }
  0xa5   : > { %v240_v4 = vmax.f32 %v239_v3, 0.0 }
  0xa7   : > { %242 = vst [vmem:[%s241_s21] sm:$0x1] %v240_v4 }
  0xae   :  { %v262_v5 = vld [vmem:[#allocation3] sm:$0xff]  ;;  %v263_v6 = vld [vmem:[#allocation3 + $0x8] sm:$0xff]  ;;  %v264_v7 = vld [vmem:[#allocation3 + $0x10] sm:$0xff] }
  0xaf   :  { %v1112_v9 = vpack.c.bf16 %v263_v6, %v262_v5  ;;  %v265_v10 = vld [vmem:[#allocation3 + $0x18] sm:$0xff]  ;;  %v266_v12 = vld [vmem:[#allocation3 + $0x20] sm:$0xff]  ;;  %v267_v13 = vld [vmem:[#allocation3 + $0x28] sm:$0xff] }
  0xb0   :  { %v1116_v11 = vpack.c.bf16 %v265_v10, %v264_v7  ;;  %v1120_v15 = vpack.c.bf16 %v267_v13, %v266_v12  ;;  %v268_v17 = vld [vmem:[#allocation3 + $0x30] sm:$0xff]  ;;  %v269_v18 = vld [vmem:[#allocation3 + $0x38] sm:$0xff]  ;;  %v270_v21 = vld [vmem:[#allocation3 + $0x40] sm:$0xff] }
  0xb1   :  { %1113 = vmatprep.subr.bf16.mxu0 %v1112_v9  ;;  %v1124_v20 = vpack.c.bf16 %v269_v18, %v268_v17  ;;  %v271_v22 = vld [vmem:[#allocation3 + $0x48] sm:$0xff]  ;;  %v272_v24 = vld [vmem:[#allocation3 + $0x50] sm:$0xff]  ;;  %v273_v25 = vld [vmem:[#allocation3 + $0x58] sm:$0xff] }
  0xb2   :  { %1115 = vmatpush3.bf16.msra.mxu0 %v1112_v9  ;;  %v1128_v23 = vpack.c.bf16 %v271_v22, %v270_v21  ;;  %v1132_v26 = vpack.c.bf16 %v273_v25, %v272_v24  ;;  %v274_v27 = vld [vmem:[#allocation3 + $0x60] sm:$0xff]  ;;  %v275_v28 = vld [vmem:[#allocation3 + $0x68] sm:$0xff]  ;;  %v276_v30 = vld [vmem:[#allocation3 + $0x70] sm:$0xff] }
  0xb3   :  { %1117 = vmatprep.subr.bf16.mxu0 %v1116_v11  ;;  %v1136_v29 = vpack.c.bf16 %v275_v28, %v274_v27  ;;  %v277_v31 = vld [vmem:[#allocation3 + $0x78] sm:$0xff] }
  0xb4   :  { %v1140_v32 = vpack.c.bf16 %v277_v31, %v276_v30 }
  0xb6   :  { %1119 = vmatpush3.bf16.msra.mxu0 %v1116_v11 }
  0xb7   :  { %1121 = vmatprep.subr.bf16.mxu0 %v1120_v15 }
  0xba   :  { %1123 = vmatpush3.bf16.msra.mxu0 %v1120_v15 }
  0xbb   :  { %1125 = vmatprep.subr.bf16.mxu0 %v1124_v20 }
  0xbe   :  { %1127 = vmatpush3.bf16.msra.mxu0 %v1124_v20 }
  0xbf   :  { %1129 = vmatprep.subr.bf16.mxu0 %v1128_v23 }
  0xc2   :  { %1131 = vmatpush3.bf16.msra.mxu0 %v1128_v23 }
  0xc3   :  { %1133 = vmatprep.subr.bf16.mxu0 %v1132_v26 }
  0xc6   :  { %1135 = vmatpush3.bf16.msra.mxu0 %v1132_v26 }
  0xc7   :  { %1137 = vmatprep.subr.bf16.mxu0 %v1136_v29 }
  0xca   :  { %1139 = vmatpush3.bf16.msra.mxu0 %v1136_v29 }
  0xcb   :  { %1141 = vmatprep.subr.bf16.mxu0 %v1140_v32 }
  0xce   :  { %1143 = vmatpush3.bf16.msra.mxu0 %v1140_v32 }
  0xd1   :  { %1040 = vmatmul.mubr.msk.f32.vlgmr.msra.gmra.mrb[0].mxu0 %vm255_vm1, %v1494_v19 }
 0x1a4   :  { %v1041_v36 = vpop.f32.mrb[0].mxu0 }
 0x1a5   :  { %v354_v37 = vadd.f32 %v1041_v36, %v261_v34  ;;  %v344_v38 = vpop.f32.mrb[1].mxu0 }
 0x1a6   :  { %v353_v39 = vadd.f32 %v344_v38, %v260_v35 }
 0x1a7   :  { %356 = vst [vmem:[#allocation2 + $0x8] sm:$0xff] %v354_v37 }
 0x1a8   :  { %355 = vst [vmem:[#allocation2] sm:$0xff] %v353_v39 }
 0x1a9 PF:  { %v368_v40 = vld [vmem:[#allocation13] sm:$0xff]  ;;  %v369_v41 = vld [vmem:[#allocation13 + $0x8] sm:$0xff]  ;;  %v370_v42 = vld [vmem:[#allocation13 + $0x10] sm:$0xff]  ;;  %s1793_s13 = sld [smem:[#allocation29_spill]]  ;;  %s1794_s25 = sld [smem:[#allocation30_spill]] }
 0x1aa   :  { %v1144_v43 = vpack.c.bf16 %v369_v41, %v368_v40  ;;  %v371_v44 = vld [vmem:[#allocation13 + $0x18] sm:$0xff]  ;;  %v372_v46 = vld [vmem:[#allocation13 + $0x20] sm:$0xff]  ;;  %v373_v47 = vld [vmem:[#allocation13 + $0x28] sm:$0xff]  ;;  %s1795_s27 = sld [smem:[#allocation31_spill]]  ;;  %s1495_s6 = smov [#allocation19]  }
 0x1ab   :  { %v1148_v45 = vpack.c.bf16 %v371_v44, %v370_v42  ;;  %v1152_v48 = vpack.c.bf16 %v373_v47, %v372_v46  ;;  %v1714_v49 = vld [vmem:[#allocation8] sm:$0xff]  ;;  %v375_v52 = vld [vmem:[#allocation13 + $0x38] sm:$0xff]  ;;  %v468_v54 = vld [vmem:[#allocation14] sm:$0xff]  ;;  %s854_s30 = sshll.u32 %s1495_s6, 4  ;;  %s855_s30 = int_to_ptr.vmem [resolvable:$true] %s854_s30 }
 0x1ac   :  { %1145 = vmatprep.subr.bf16.mxu0 %v1144_v43  ;;  %v374_v51 = vld [vmem:[#allocation13 + $0x30] sm:$0xff]  ;;  %v469_v55 = vld [vmem:[#allocation14 + $0x8] sm:$0xff]  ;;  %v471_v57 = vld [vmem:[#allocation14 + $0x18] sm:$0xff]  ;;  %s1440_s28 = scalar_lea.vmem %s855_s30, 256  ;;  %p1445_p5 = scmp.lt.s32.totalorder %s855_s30, %s855_s30 }
 0x1ad   :  { %1147 = vmatpush3.bf16.msra.mxu0 %v1144_v43  ;;  %v470_v56 = vld [vmem:[#allocation14 + $0x10] sm:$0xff]  ;;  %v1176_v58 = vpack.c.bf16 %v469_v55, %v468_v54  ;;  %v1156_v60 = vpack.c.bf16 %v375_v52, %v374_v51  ;;  %v472_v61 = vld [vmem:[#allocation14 + $0x20] sm:$0xff]  ;;  %v473_v62 = vld [vmem:[#allocation14 + $0x28] sm:$0xff]  ;;  %p1441_p4 = scmp.ne.s32.totalorder %s855_s30, %s1440_s28  ;;  %p1446_p6 = scmp.lt.s32.totalorder %s1440_s28, %s1440_s28 }
 0x1ae   :  { %1149 = vmatprep.subr.bf16.mxu0 %v1148_v45  ;;  %v1180_v59 = vpack.c.bf16 %v471_v57, %v470_v56  ;;  %v376_v63 = vld [vmem:[#allocation13 + $0x40] sm:$0xff]  ;;  %v377_v1 = vld [vmem:[#allocation13 + $0x48] sm:$0xff]  ;;  %v1184_v2 = vpack.c.bf16 %v473_v62, %v472_v61  ;;  %v474_v4 = vld [vmem:[#allocation14 + $0x30] sm:$0xff] }
 0x1af   :  { %v364_v50 = vld [vmem:[#allocation2] sm:$0xff]  ;;  %1177 = vmatprep.subr.bf16.mxu1 %v1176_v58  ;;  %v1160_v3 = vpack.c.bf16 %v377_v1, %v376_v63  ;;  %v475_v5 = vld [vmem:[#allocation14 + $0x38] sm:$0xff]  ;;  %v378_v6 = vld [vmem:[#allocation13 + $0x50] sm:$0xff]  ;;  %p1447_p7 = por %p1446_p6, %p1445_p5 }
 0x1b0   :  { %v366_v53 = vadd.f32 %v364_v50, %v1714_v49  ;;  %1179 = vmatpush3.bf16.msra.mxu1 %v1176_v58  ;;  %v379_v7 = vld [vmem:[#allocation13 + $0x58] sm:$0xff]  ;;  %v1188_v8 = vpack.c.bf16 %v475_v5, %v474_v4  ;;  %v476_v10 = vld [vmem:[#allocation14 + $0x40] sm:$0xff]  ;;  %v477_v11 = vld [vmem:[#allocation14 + $0x48] sm:$0xff] }
 0x1b1   :  { %1151 = vmatpush3.bf16.msra.mxu0 %v1148_v45  ;;  %1181 = vmatprep.subr.bf16.mxu1 %v1180_v59  ;;  %v1164_v9 = vpack.c.bf16 %v379_v7, %v378_v6  ;;  %v380_v12 = vld [vmem:[#allocation13 + $0x60] sm:$0xff]  ;;  %v381_v13 = vld [vmem:[#allocation13 + $0x68] sm:$0xff]  ;;  %v1192_v14 = vpack.c.bf16 %v477_v11, %v476_v10  ;;  %v478_v16 = vld [vmem:[#allocation14 + $0x50] sm:$0xff]  ;;  %p1448_p8 = pnand %p1447_p7, %p1441_p4 }
 0x1b2   :  { %1074 = vmatprep.mubr.f32.mxu0 %v366_v53  ;;  %1153 = vmatprep.subr.bf16.mxu0 %v1152_v48  ;;  %v1168_v15 = vpack.c.bf16 %v381_v13, %v380_v12  ;;  %v479_v17 = vld [vmem:[#allocation14 + $0x58] sm:$0xff]  ;;  %v382_v18 = vld [vmem:[#allocation13 + $0x70] sm:$0xff]  ;;  %v480_v22 = vld [vmem:[#allocation14 + $0x60] sm:$0xff] }
 0x1b3   :  { %v383_v19 = vld [vmem:[#allocation13 + $0x78] sm:$0xff]  ;;  %v1196_v20 = vpack.c.bf16 %v479_v17, %v478_v16  ;;  %v481_v23 = vld [vmem:[#allocation14 + $0x68] sm:$0xff]  ;;  %v482_v28 = vld [vmem:[#allocation14 + $0x70] sm:$0xff] }
 0x1b4   :  { %1183 = vmatpush3.bf16.msra.mxu1 %v1180_v59  ;;  %v1172_v21 = vpack.c.bf16 %v383_v19, %v382_v18  ;;  %v1717_v24 = vld [vmem:[#allocation8 + $0x8] sm:$0xff]  ;;  %v365_v25 = vld [vmem:[#allocation2 + $0x8] sm:$0xff]  ;;  %v1200_v26 = vpack.c.bf16 %v481_v23, %v480_v22  ;;  %v588_v33 = vld [vmem:[#allocation16] sm:$0xff] }
 0x1b5   :  { %1155 = vmatpush3.bf16.msra.mxu0 %v1152_v48  ;;  %1185 = vmatprep.subr.bf16.mxu1 %v1184_v2  ;;  %v367_v27 = vadd.f32 %v365_v25, %v1717_v24  ;;  %v483_v29 = vld [vmem:[#allocation14 + $0x78] sm:$0xff]  ;;  %v589_v31 = vld [vmem:[#allocation16 + $0x8] sm:$0xff]  ;;  %v590_v35 = vld [vmem:[#allocation16 + $0x10] sm:$0xff] }
 0x1b6   :  { %1157 = vmatprep.subr.bf16.mxu0 %v1156_v60  ;;  %v1204_v30 = vpack.c.bf16 %v483_v29, %v482_v28  ;;  %v591_v32 = vld [vmem:[#allocation16 + $0x18] sm:$0xff]  ;;  %v593_v36 = vld [vmem:[#allocation16 + $0x28] sm:$0xff]  ;;  %v1210_v38 = vpack.c.bf16 %v590_v35, %v588_v33  ;;  %v592_v40 = vld [vmem:[#allocation16 + $0x20] sm:$0xff] }
 0x1b7   :  { %v1208_v34 = vpack.c.bf16 %v591_v32, %v589_v31  ;;  %v595_v37 = vld [vmem:[#allocation16 + $0x38] sm:$0xff]  ;;  %v594_v41 = vld [vmem:[#allocation16 + $0x30] sm:$0xff]  ;;  %v597_v42 = vld [vmem:[#allocation16 + $0x48] sm:$0xff] }
 0x1b8   :  { %1187 = vmatpush3.bf16.msra.mxu1 %v1184_v2  ;;  %v1212_v39 = vpack.c.bf16 %v595_v37, %v593_v36  ;;  %v599_v43 = vld [vmem:[#allocation16 + $0x58] sm:$0xff]  ;;  %v1214_v44 = vpack.c.bf16 %v594_v41, %v592_v40  ;;  %v596_v46 = vld [vmem:[#allocation16 + $0x40] sm:$0xff]  ;;  %v598_v47 = vld [vmem:[#allocation16 + $0x50] sm:$0xff] }
 0x1b9   :  { %1159 = vmatpush3.bf16.msra.mxu0 %v1156_v60  ;;  %1189 = vmatprep.subr.bf16.mxu1 %v1188_v8  ;;  %v1216_v45 = vpack.c.bf16 %v599_v43, %v597_v42  ;;  %v601_v48 = vld [vmem:[#allocation16 + $0x68] sm:$0xff]  ;;  %v603_v50 = vld [vmem:[#allocation16 + $0x78] sm:$0xff]  ;;  %v1218_v51 = vpack.c.bf16 %v598_v47, %v596_v46  ;;  %v600_v53 = vld [vmem:[#allocation16 + $0x60] sm:$0xff] }
 0x1ba   :  { %1161 = vmatprep.subr.bf16.mxu0 %v1160_v3  ;;  %v1220_v52 = vpack.c.bf16 %v603_v50, %v601_v48  ;;  %v602_v54 = vld [vmem:[#allocation16 + $0x70] sm:$0xff]  ;;  %v605_v55 = vld [vmem:[#allocation16 + $0x88] sm:$0xff]  ;;  %v607_v56 = vld [vmem:[#allocation16 + $0x98] sm:$0xff] }
 0x1bb   :  { %v1222_v57 = vpack.c.bf16 %v602_v54, %v600_v53  ;;  %v1224_v58 = vpack.c.bf16 %v607_v56, %v605_v55  ;;  %v604_v59 = vld [vmem:[#allocation16 + $0x80] sm:$0xff]  ;;  %v606_v60 = vld [vmem:[#allocation16 + $0x90] sm:$0xff]  ;;  %v609_v6 = vld [vmem:[#allocation16 + $0xa8] sm:$0xff] }
 0x1bc   :  { %1191 = vmatpush3.bf16.msra.mxu1 %v1188_v8  ;;  %v1226_v61 = vpack.c.bf16 %v606_v60, %v604_v59  ;;  %v907_v62 = vld [vmem:[%s1770_s7] ss:$0 sm:$0xff]  ;;  %v611_v7 = vld [vmem:[#allocation16 + $0xb8] sm:$0xff]  ;;  %v610_v10 = vld [vmem:[#allocation16 + $0xb0] sm:$0xff] }
 0x1bd   :  { %1163 = vmatpush3.bf16.msra.mxu0 %v1160_v3  ;;  %1193 = vmatprep.subr.bf16.mxu1 %v1192_v14  ;;  %v1228_v8 = vpack.c.bf16 %v611_v7, %v609_v6  ;;  %v613_v12 = vld [vmem:[#allocation16 + $0xc8] sm:$0xff]  ;;  %v615_v13 = vld [vmem:[#allocation16 + $0xd8] sm:$0xff]  ;;  %v614_v16 = vld [vmem:[#allocation16 + $0xd0] sm:$0xff] }
 0x1be   :  { %1165 = vmatprep.subr.bf16.mxu0 %v1164_v9  ;;  %v617_v18 = vld [vmem:[#allocation16 + $0xe8] sm:$0xff]  ;;  %v619_v19 = vld [vmem:[#allocation16 + $0xf8] sm:$0xff]  ;;  %v618_v22 = vld [vmem:[#allocation16 + $0xf0] sm:$0xff] }
 0x1bf   :  { %v729_v25 = vld [vmem:[#allocation17 + $0x80] sm:$0xff]  ;;  %v714_v29 = vld [vmem:[#allocation17 + $0x8] sm:$0xff]  ;;  %v732_v31 = vld [vmem:[#allocation17 + $0x98] sm:$0xff] }
 0x1c0   :  { %1195 = vmatpush3.bf16.msra.mxu1 %v1192_v14  ;;  %v1232_v14 = vpack.c.bf16 %v615_v13, %v613_v12  ;;  %v716_v35 = vld [vmem:[#allocation17 + $0x18] sm:$0xff]  ;;  %v733_v36 = vld [vmem:[#allocation17 + $0xa0] sm:$0xff]  ;;  %v734_v37 = vld [vmem:[#allocation17 + $0xa8] sm:$0xff] }
 0x1c1   :  { %1167 = vmatpush3.bf16.msra.mxu0 %v1164_v9  ;;  %1197 = vmatprep.subr.bf16.mxu1 %v1196_v20  ;;  %v608_v9 = vld [vmem:[#allocation16 + $0xa0] sm:$0xff]  ;;  %v718_v41 = vld [vmem:[#allocation17 + $0x28] sm:$0xff]  ;;  %v735_v42 = vld [vmem:[#allocation17 + $0xb0] sm:$0xff] }
 0x1c2   :  { %1169 = vmatprep.subr.bf16.mxu0 %v1168_v15  ;;  %v1230_v11 = vpack.c.bf16 %v610_v10, %v608_v9  ;;  %v717_v40 = vld [vmem:[#allocation17 + $0x20] sm:$0xff]  ;;  %v736_v43 = vld [vmem:[#allocation17 + $0xb8] sm:$0xff]  ;;  %v719_v46 = vld [vmem:[#allocation17 + $0x30] sm:$0xff] }
 0x1c3   :  { %v720_v47 = vld [vmem:[#allocation17 + $0x38] sm:$0xff]  ;;  %v737_v48 = vld [vmem:[#allocation17 + $0xc0] sm:$0xff]  ;;  %v738_v50 = vld [vmem:[#allocation17 + $0xc8] sm:$0xff] }
 0x1c4   :  { %1199 = vmatpush3.bf16.msra.mxu1 %v1196_v20  ;;  %v1236_v20 = vpack.c.bf16 %v619_v19, %v617_v18  ;;  %v721_v53 = vld [vmem:[#allocation17 + $0x40] sm:$0xff]  ;;  %v722_v54 = vld [vmem:[#allocation17 + $0x48] sm:$0xff]  ;;  %v739_v55 = vld [vmem:[#allocation17 + $0xd0] sm:$0xff] }
 0x1c5   :  { %1171 = vmatpush3.bf16.msra.mxu0 %v1168_v15  ;;  %1201 = vmatprep.subr.bf16.mxu1 %v1200_v26  ;;  %v612_v15 = vld [vmem:[#allocation16 + $0xc0] sm:$0xff]  ;;  %v740_v56 = vld [vmem:[#allocation17 + $0xd8] sm:$0xff]  ;;  %v723_v59 = vld [vmem:[#allocation17 + $0x50] sm:$0xff] }
 0x1c6   :  { %1173 = vmatprep.subr.bf16.mxu0 %v1172_v21  ;;  %v1234_v17 = vpack.c.bf16 %v614_v16, %v612_v15  ;;  %v724_v60 = vld [vmem:[#allocation17 + $0x58] sm:$0xff]  ;;  %v909_v9 = vld [vmem:[%s1777_s14] ss:$0 sm:$0xff]  ;;  %v726_v18 = vld [vmem:[#allocation17 + $0x68] sm:$0xff] }
 0x1c7   :  { %v910_v12 = vld [vmem:[%s1778_s15] ss:$0 sm:$0xff] }
 0x1c8   :  { %1203 = vmatpush3.bf16.msra.mxu1 %v1200_v26  ;;  %v730_v26 = vld [vmem:[#allocation17 + $0x88] sm:$0xff] }
 0x1c9   :  { %1175 = vmatpush3.bf16.msra.mxu0 %v1172_v21  ;;  %1205 = vmatprep.subr.bf16.mxu1 %v1204_v30  ;;  %v616_v21 = vld [vmem:[#allocation16 + $0xe0] sm:$0xff]  ;;  %v1240_v28 = vpack.c.bf16 %v730_v26, %v729_v25  ;;  %v622_v25 = vlaneseq }
 0x1ca   :  { %1209 = vmatprep.subr.bf16.mxu0 %v1208_v34  ;;  %v1238_v23 = vpack.c.bf16 %v618_v22, %v616_v21  ;;  %v715_v34 = vld [vmem:[#allocation17 + $0x10] sm:$0xff]  ;;  %v728_v22 = vld [vmem:[#allocation17 + $0x78] sm:$0xff] }
 0x1cb   :  { %v623_v26 = vshrl.u32 %v622_v25, 7 }
 0x1cc   :  { %1075 = vmatmul.mubr.f32.vlgmr.msra.gmra.mrb[0].mxu0 %v367_v27  ;;  %1207 = vmatpush3.bf16.msra.mxu1 %v1204_v30  ;;  %v713_v27 = vld [vmem:[#allocation17] sm:$0xff]  ;;  %v731_v30 = vld [vmem:[#allocation17 + $0x90] sm:$0xff] }
 0x1cd   :  { %696 = vmatprep.mubr.f32.mxu0 %v1493_v0  ;;  %1211 = vmatpush1.bf16.msra.mxu0 %v1210_v38  ;;  %v1242_v32 = vpack.c.bf16 %v714_v29, %v713_v27  ;;  %v1244_v33 = vpack.c.bf16 %v732_v31, %v731_v30  ;;  %v1246_v38 = vpack.c.bf16 %v716_v35, %v715_v34  ;;  %v624_v27 = vsub.s32 0, %v623_v26 }
 0x1ce   :  { %1213 = vmatprep.subr.bf16.mxu0 %v1212_v39  ;;  %1241 = vmatprep.subr.bf16.mxu1 %v1240_v28  ;;  %v1248_v39 = vpack.c.bf16 %v734_v37, %v733_v36  ;;  %v628_v28 = vsub.s32 1, %v623_v26 }
 0x1d1   :  { %1215 = vmatpush1.bf16.msra.mxu0 %v1214_v44  ;;  %v1250_v44 = vpack.c.bf16 %v718_v41, %v717_v40 }
 0x1d2   :  { %1217 = vmatprep.subr.bf16.mxu0 %v1216_v45  ;;  %v1252_v45 = vpack.c.bf16 %v736_v43, %v735_v42 }
 0x1d5   :  { %1219 = vmatpush1.bf16.msra.mxu0 %v1218_v51  ;;  %v1254_v51 = vpack.c.bf16 %v720_v47, %v719_v46 }
 0x1d6   :  { %1221 = vmatprep.subr.bf16.mxu0 %v1220_v52  ;;  %v1256_v52 = vpack.c.bf16 %v738_v50, %v737_v48 }
 0x1d9   :  { %1223 = vmatpush1.bf16.msra.mxu0 %v1222_v57  ;;  %v1258_v57 = vpack.c.bf16 %v722_v54, %v721_v53  ;;  %v913_v54 = vld [vmem:[%s1795_s27] ss:$0 sm:$0xff] }
 0x1da   :  { %1225 = vmatprep.subr.bf16.mxu0 %v1224_v58  ;;  %v1260_v58 = vpack.c.bf16 %v740_v56, %v739_v55 }
 0x1dd   :  { %1227 = vmatpush1.bf16.msra.mxu0 %v1226_v61  ;;  %v741_v61 = vld [vmem:[#allocation17 + $0xe0] sm:$0xff] }
 0x1de   :  { %1229 = vmatprep.subr.bf16.mxu0 %v1228_v8 }
 0x1e1   :  { %1231 = vmatpush1.bf16.msra.mxu0 %v1230_v11 }
 0x1e2   :  { %1233 = vmatprep.subr.bf16.mxu0 %v1232_v14 }
 0x1e5   :  { %1235 = vmatpush1.bf16.msra.mxu0 %v1234_v17  ;;  %v725_v17 = vld [vmem:[#allocation17 + $0x60] sm:$0xff] }
 0x1e6   :  { %1237 = vmatprep.subr.bf16.mxu0 %v1236_v20  ;;  %v1266_v19 = vpack.c.bf16 %v726_v18, %v725_v17  ;;  %v743_v20 = vld [vmem:[#allocation17 + $0xf0] sm:$0xff] }
 0x1e9   :  { %1239 = vmatpush1.bf16.msra.mxu0 %v1238_v23 }
 0x29f   :  { %v1076_v63 = vpop.f32.mrb[0].mxu0 }
 0x2a0   :  { %v463_v1 = vadd.f32 %v1076_v63, %v907_v62  ;;  %v457_v2 = vpop.f32.mrb[1].mxu0  ;;  %v1262_v63 = vpack.c.bf16 %v724_v60, %v723_v59 }
 0x2a1   :  { %v458_v3 = vadd.f32 %v907_v62, %v457_v2  ;;  %v742_v62 = vld [vmem:[#allocation17 + $0xe8] sm:$0xff]  ;;  %v908_v2 = vld [vmem:[%s1772_s9] ss:$0 sm:$0xff] }
 0x2a2   :  { %v467_v5 = vmax.f32 %v463_v1, 0.0  ;;  %v1264_v1 = vpack.c.bf16 %v742_v62, %v741_v61 }
 0x2a3   :  { %v466_v4 = vmax.f32 %v458_v3, 0.0 }
 0x2a5   :  { %1109 = vmatprep.mubr.f32.mxu1 %v466_v4 }
 0x2a6   :  { %1110 = vmatmul.mubr.f32.vlgmr.msra.gmra.mrb[0].mxu1 %v467_v5 }
 0x2a7   :  { %1243 = vmatpush3.bf16.msra.mxu1 %v1242_v32 }
 0x2a8   :  { %1245 = vmatprep.subr.bf16.mxu1 %v1244_v33 }
 0x2ab   :  { %1247 = vmatpush3.bf16.msra.mxu1 %v1246_v38 }
 0x2ac   :  { %1249 = vmatprep.subr.bf16.mxu1 %v1248_v39 }
 0x2af   :  { %1251 = vmatpush3.bf16.msra.mxu1 %v1250_v44  ;;  %v911_v44 = vld [vmem:[%s1793_s13] ss:$0 sm:$0xff] }
 0x2b0   :  { %1253 = vmatprep.subr.bf16.mxu1 %v1252_v45 }
 0x2b3   :  { %1255 = vmatpush3.bf16.msra.mxu1 %v1254_v51  ;;  %v912_v51 = vld [vmem:[%s1794_s25] ss:$0 sm:$0xff] }
 0x2b4   :  { %1257 = vmatprep.subr.bf16.mxu1 %v1256_v52 }
 0x2b7   :  { %1259 = vmatpush3.bf16.msra.mxu1 %v1258_v57 }
 0x2b8   :  { %1261 = vmatprep.subr.bf16.mxu1 %v1260_v58 }
 0x2bb   :  { %1263 = vmatpush3.bf16.msra.mxu1 %v1262_v63 }
 0x2bc   :  { %1265 = vmatprep.subr.bf16.mxu1 %v1264_v1 }
 0x2bf   :  { %1267 = vmatpush3.bf16.msra.mxu1 %v1266_v19 }
 0x379   :  { %v1111_v3 = vpop.f32.mrb[0].mxu1 }
 0x37a   :  { %v563_v4 = vadd.f32 %v1111_v3, %v908_v2  ;;  %v557_v5 = vpop.f32.mrb[1].mxu1 }
 0x37b   :  { %v558_v6 = vadd.f32 %v908_v2, %v557_v5 }
 0x37c   :  { %v567_v7 = vmax.f32 %v563_v4, 0.0 }
 0x37d   :  { %v566_v8 = vmax.f32 %v558_v6, 0.0 }
 0x37e   :  { %v569_v10 = vadd.f32 %v567_v7, %v1717_v24  ;;  %v744_v24 = vld [vmem:[#allocation17 + $0xf8] sm:$0xff] }
 0x37f   :  { %v568_v11 = vadd.f32 %v566_v8, %v1714_v49  ;;  %v1268_v21 = vpack.c.bf16 %v744_v24, %v743_v20  ;;  %v727_v49 = vld [vmem:[#allocation17 + $0x70] sm:$0xff] }
 0x380   :  { %v578_v14 = vmul.f32 %v909_v9, %v569_v10  ;;  %v1270_v23 = vpack.c.bf16 %v728_v22, %v727_v49 }
 0x381   :  { %v577_v13 = vmul.f32 %v909_v9, %v568_v11  ;;  %1269 = vmatprep.subr.bf16.mxu1 %v1268_v21 }
 0x382   :  { %v587_v16 = vadd.f32 %v910_v12, %v578_v14  ;;  %1271 = vmatpush3.bf16.msra.mxu1 %v1270_v23 }
 0x383   :  { %v586_v15 = vadd.f32 %v910_v12, %v577_v13 }
 0x385   :  { %697 = vmatmul.mubr.f32.vlgmr.msra.gmra.mrb[2].mxu0 %v586_v15 }
 0x386   :  { %702 = vmatprep.mubr.f32.mxu0 %v1493_v0  ;;  %v620_v0 = vld [vmem:[%s1774_s11] sm:$0x3] }
 0x387   :  { %v625_v29 = vrot.slane %v620_v0, %v624_v27  ;;  %v629_v30 = vrot.slane %v620_v0, %v628_v28 }
 0x389   :  { %703 = vmatmul.mubr.f32.gmra.mrb[4].mxu0 %v587_v16 }
 0x458   :  { %v698_v31 = vpop.f32.mrb[2].mxu0 }
 0x459   :  { %v699_v32 = vadd.f32 %v698_v31, %v625_v29  ;;  %v700_v33 = vpop.f32.mrb[3].mxu0 }
 0x45a   :  { %v701_v34 = vadd.f32 %v700_v33, %v629_v30 }
 0x45b   :  { %v709_v37 = vmax.f32 %v699_v32, 0.0 }
 0x45c   :  { %v710_v35 = vmax.f32 %v701_v34, 0.0  ;;  %v704_v36 = vpop.f32.mrb[4].mxu0 }
 0x45d   :  { %v705_v38 = vadd.f32 %v704_v36, %v625_v29  ;;  %v706_v39 = vpop.f32.mrb[5].mxu0 }
 0x45e   :  { %v707_v40 = vadd.f32 %v706_v39, %v629_v30  ;;  %816 = vmatprep.mubr.f32.mxu1 %v710_v35 }
 0x45f   :  { %817 = vmatmul.mubr.f32.vlgmr.msra.gmra.mrb[2].mxu1 %v709_v37  ;;  %v711_v42 = vmax.f32 %v705_v38, 0.0 }
 0x460   :  { %v712_v41 = vmax.f32 %v707_v40, 0.0 }
 0x462   :  { %821 = vmatprep.mubr.f32.mxu1 %v712_v41 }
 0x463   :  { %822 = vmatmul.mubr.f32.gmra.mrb[4].mxu1 %v711_v42 }
 0x532   :  { %v1001_v43 = vpop.f32.mrb[2].mxu1 }
 0x533   :  { %v1002_v45 = vpop.f32.mrb[3].mxu1 }
 0x534   :  { %v1003_v46 = vadd.f32 %v1002_v45, %v1001_v43 }
 0x536   :  { %v819_v47 = vadd.f32 %v1003_v46, %v911_v44  ;;  %v1004_v48 = vpop.f32.mrb[4].mxu1 }
 0x537   :  { %v1005_v50 = vpop.f32.mrb[5].mxu1 }
 0x538   :  { %v827_v52 = vadd.f32 %v819_v47, %v586_v15  ;;  %v1006_v53 = vadd.f32 %v1005_v50, %v1004_v48 }
 0x53a   :  { %v824_v55 = vadd.f32 %v1006_v53, %v911_v44  ;;  %v836_v56 = vmul.f32 %v912_v51, %v827_v52 }
 0x53c   :  { %v828_v57 = vadd.f32 %v824_v55, %v587_v16  ;;  %v845_v58 = vadd.f32 %v913_v54, %v836_v56 }
 0x53e   :  { %v837_v59 = vmul.f32 %v912_v51, %v828_v57  ;;  %847 = vst [vmem:[#allocation19] sm:$0xff] %v845_v58 }
 0x540   :  { %v846_v60 = vadd.f32 %v913_v54, %v837_v59 }
 0x542   :  { %848 = vst [vmem:[#allocation19 + $0x8] sm:$0xff] %v846_v60 }
 0x543   :  { %1451 = shalt.err (!%p1448_p8)
}
 0x544   :  { %s1796_s20 = sld [smem:[#allocation32_spill]] }
 0x54a   :  { %s1452_s8 = scalar_lea.hbm %s1796_s20, 256 }
 0x54b   :  { %p1453_p9 = scmp.ne.s32.totalorder %s1796_s20, %s1452_s8  ;;  %p1456_p10 = scmp.lt.u32.totalorder %s1452_s8, %s1796_s20 }
 0x54d   :  { %p1458_p11 = pnand %p1456_p10, %p1453_p9 }
 0x54f   :  { %1461 = shalt.err (!%p1458_p11)
}
 0x550   :  { %860 = dma.vmem_to_hbm [thread:$0]  %s855_s30, 256, %s1796_s20, [#allocation10], %s1485_s19, %s1485_s19, %s1486_s1  }
 0x551   :  { %1476 = dma.done.wait [#allocation10], 256  }
 0x552   :  { %1477 = vsyncadd [#allocation10], 4294967040 }
 0x553   :  { %864 = vsyncpa [#allocation9], 1 }
 0x554   :  { %865 = vsyncpa [#allocation12], 1 }
 0x555   :  { %866 = vsyncpa [#allocation15], 1 }
 0x556   :  { %867 = vsyncpa [#allocation18], 1 }
 0x557   :  { %868 = vsyncpa [#allocation10], 1 }

</bundles_post_ra>
